<compile_context>
chip_gen: v7x
topology: tpu7x:2x2x1
jax: 0.10.0
libtpu: 0.0.40
codegen_flags: <defaults>
</compile_context>

<pallas_src>
import functools

import jax
import jax.numpy as jnp
from jax.experimental import pallas as pl
from jax.experimental.pallas import tpu as pltpu

LANE = 128
TARGET_BLOCK_BYTES = 6 << 20   # ~6 MiB per input block per pipeline buffer


def _bpr_loss_kernel(pred_ref, label_ref, out_ref, acc_ref, *,
                     inv_n, true_n, tn, need_mask):
    k = pl.program_id(1)

    @pl.when(k == 0)
    def _():
        acc_ref[...] = jnp.zeros_like(acc_ref)

    pred = pred_ref[...].astype(jnp.float32)
    label = label_ref[...].astype(jnp.float32)
    # (1 - 2*label) * pred, fused as pred - 2*(label*pred); accumulate in f32.
    prod = pred - 2.0 * (label * pred)

    if need_mask:
        # Zero contributions from the ragged (out-of-bounds) tail of the last
        # N-chunk; Pallas leaves that part of a partial block unspecified.
        col = jax.lax.broadcasted_iota(jnp.int32, prod.shape, 1) + k * tn
        prod = jnp.where(col < true_n, prod, 0.0)

    tb = prod.shape[0]
    # Lane-wise partial sums: plain VPU vreg adds; cross-lane reduce deferred.
    acc_ref[...] += prod.reshape(tb, tn // LANE, LANE).sum(axis=1)

    @pl.when(k == pl.num_programs(1) - 1)
    def _():
        row_sum = jnp.sum(acc_ref[...], axis=-1, keepdims=True)
        out_ref[...] = (row_sum * inv_n).astype(out_ref.dtype)


def _sublane(dtype) -> int:
    # Second-to-last block dim tiling: 8 for >=32-bit, 16 for bf16, 32 for int8.
    return max(8, 32 // jnp.dtype(dtype).itemsize)


def bpr_loss(pred: jax.Array, label: jax.Array) -> jax.Array:
    assert pred.shape == label.shape and pred.ndim == 2
    B, N = pred.shape
    p_bytes = jnp.dtype(pred.dtype).itemsize
    l_bytes = jnp.dtype(label.dtype).itemsize
    sub = max(_sublane(pred.dtype), _sublane(label.dtype))

    # Reduction-axis chunk: keep it large (big, efficient DMAs) regardless of
    # N; no divisibility search, ragged tail handled by in-kernel masking.
    tn = min(32 * LANE, pl.cdiv(N, LANE) * LANE)

    # Batch tile: as many rows as fit ~TARGET_BLOCK_BYTES per pred block.
    tb = TARGET_BLOCK_BYTES // (tn * p_bytes)
    tb = max(sub, (tb // sub) * sub)
    tb = min(tb, pl.cdiv(B, sub) * sub)

    # v7x megacore: ensure the "parallel" batch axis has >= 2 tiles whenever
    # the batch is big enough to split, so the second TensorCore isn't idle.
    if pl.cdiv(B, tb) < 2 and B > sub:
        tb = max(sub, pl.cdiv(pl.cdiv(B, 2), sub) * sub)

    grid = (pl.cdiv(B, tb), pl.cdiv(N, tn))

    # Double-buffered footprint: 2 inputs x 2 buffers x block (+ tiny out/acc).
    in_block_bytes = tb * tn * (p_bytes + l_bytes)
    vmem_limit = int(min(56 << 20, max(32 << 20, 2 * in_block_bytes + (8 << 20))))

    kernel = functools.partial(
        _bpr_loss_kernel,
        inv_n=1.0 / N,
        true_n=N,
        tn=tn,
        need_mask=(N % tn != 0),
    )

    out = pl.pallas_call(
        kernel,
        out_shape=jax.ShapeDtypeStruct((B, 1), pred.dtype),
        grid_spec=pltpu.PrefetchScalarGridSpec(
            num_scalar_prefetch=0,
            grid=grid,
            in_specs=[
                pl.BlockSpec((tb, tn), lambda i, k: (i, k)),
                pl.BlockSpec((tb, tn), lambda i, k: (i, k)),
            ],
            out_specs=pl.BlockSpec((tb, 1), lambda i, k: (i, 0)),
            scratch_shapes=[pltpu.VMEM((tb, LANE), jnp.float32)],
        ),
        compiler_params=pltpu.CompilerParams(
            dimension_semantics=("parallel", "arbitrary"),
            vmem_limit_bytes=vmem_limit,
        ),
    )(pred, label)
    return out[:, 0]  # (B,), matching torch.mean(..., dim=-1)


if __name__ == "__main__":
    key = jax.random.PRNGKey(0)
    k_pred, k_label, k_pred2, k_label2 = jax.random.split(key, 4)

    # Case 1: N=200 is not 128-aligned -> exercises the in-kernel ragged mask.
    B, N = 8, 200
    pred = jax.random.normal(k_pred, (B, N), dtype=jnp.float32)
    label = jax.random.bernoulli(k_label, p=0.5, shape=(B, N)).astype(jnp.float32)
    loss = bpr_loss(pred, label)
    jax.block_until_ready(loss)
    ref = jnp.mean((1.0 - 2.0 * label) * pred, axis=-1)
    assert loss.shape == (B,)
    assert jnp.allclose(loss, ref, atol=1e-5, rtol=1e-5)

    # Case 2: multiple batch tiles (partial last tile) and 2 reduction chunks.
    B2, N2 = 20, 4224
    pred2 = jax.random.normal(k_pred2, (B2, N2), dtype=jnp.float32)
    label2 = jax.random.bernoulli(k_label2, p=0.5, shape=(B2, N2)).astype(jnp.float32)
    loss2 = bpr_loss(pred2, label2)
    jax.block_until_ready(loss2)
    ref2 = jnp.mean((1.0 - 2.0 * label2) * pred2, axis=-1)
    assert loss2.shape == (B2,)
    assert jnp.allclose(loss2, ref2, atol=1e-5, rtol=1e-5)

    print("KERNEL_OK")
</pallas_src>

<mosaic_0001>
module attributes {stable_mosaic.version = 11 : i64} {
  func.func @_bpr_loss_kernel(%arg0: i32, %arg1: i32, %arg2: memref<8x256xf32, #tpu.memory_space<vmem>>, %arg3: memref<8x256xf32, #tpu.memory_space<vmem>>, %arg4: memref<8x1xf32, #tpu.memory_space<vmem>>, %arg5: memref<8x128xf32, #tpu.memory_space<vmem>>) attributes {dimension_semantics = [#tpu.dimension_semantics<parallel>, #tpu.dimension_semantics<arbitrary>], iteration_bounds = array<i64: 1, 1>, scalar_prefetch = 0 : i64, scratch_operands = 1 : i64, tpu.core_type = #tpu.core_type<tc>, window_params = [{transform_indices = @transform_0, window_bounds = array<i64: 8, 256>}, {transform_indices = @transform_1, window_bounds = array<i64: 8, 256>}, {transform_indices = @transform_2, window_bounds = array<i64: 8, 1>}]} {
    %c0_i32 = arith.constant 0 : i32
    %0 = arith.cmpi eq, %arg1, %c0_i32 : i32
    %1 = arith.extui %0 : i1 to i32
    %c0_i32_0 = arith.constant 0 : i32
    %2 = arith.cmpi ne, %1, %c0_i32_0 : i32
    scf.if %2 {
      %cst_12 = arith.constant 0.000000e+00 : f32
      %25 = vector.broadcast %cst_12 : f32 to vector<8x128xf32>
      %c0_13 = arith.constant 0 : index
      %c0_14 = arith.constant 0 : index
      %26 = vector.load %arg5[%c0_13, %c0_14] : memref<8x128xf32, #tpu.memory_space<vmem>>, vector<8x128xf32>
      tpu.vector_store %arg5[%c0_13, %c0_14], %25 {strides = array<i32>} : memref<8x128xf32, #tpu.memory_space<vmem>>, vector<8x128xf32>,
    } else {
    }
    %c0 = arith.constant 0 : index
    %c0_1 = arith.constant 0 : index
    %3 = vector.load %arg2[%c0, %c0_1] : memref<8x256xf32, #tpu.memory_space<vmem>>, vector<8x256xf32>
    %c0_2 = arith.constant 0 : index
    %c0_3 = arith.constant 0 : index
    %4 = vector.load %arg3[%c0_2, %c0_3] : memref<8x256xf32, #tpu.memory_space<vmem>>, vector<8x256xf32>
    %5 = arith.mulf %4, %3 : vector<8x256xf32>
    %cst = arith.constant 2.000000e+00 : f32
    %6 = vector.broadcast %cst : f32 to vector<8x256xf32>
    %7 = arith.mulf %6, %5 : vector<8x256xf32>
    %8 = arith.subf %3, %7 : vector<8x256xf32>
    %9 = tpu.iota {dimensions = array<i32: 1>} : vector<8x256xi32>
    %c256_i32 = arith.constant 256 : i32
    %10 = arith.muli %arg1, %c256_i32 : i32
    %11 = vector.broadcast %10 : i32 to vector<8x256xi32>
    %12 = arith.addi %9, %11 : vector<8x256xi32>
    %c200_i32 = arith.constant 200 : i32
    %13 = vector.broadcast %c200_i32 : i32 to vector<8x256xi32>
    %14 = arith.cmpi slt, %12, %13 : vector<8x256xi32>
    %cst_4 = arith.constant 0.000000e+00 : f32
    %15 = vector.broadcast %cst_4 : f32 to vector<8x256xf32>
    %16 = arith.select %14, %8, %15 : vector<8x256xi1>, vector<8x256xf32>
    %c0_5 = arith.constant 0 : index
    %c0_6 = arith.constant 0 : index
    %17 = vector.load %arg5[%c0_5, %c0_6] : memref<8x128xf32, #tpu.memory_space<vmem>>, vector<8x128xf32>
    %18 = vector.shape_cast %16 : vector<8x256xf32> to vector<8x2x128xf32>
    %cst_7 = arith.constant dense<0.000000e+00> : vector<8x128xf32>
    %19 = vector.multi_reduction <add>, %18, %cst_7 [1] : vector<8x2x128xf32> to vector<8x128xf32>
    %20 = arith.addf %17, %19 : vector<8x128xf32>
    %c0_8 = arith.constant 0 : index
    %c0_9 = arith.constant 0 : index
    %21 = vector.load %arg5[%c0_8, %c0_9] : memref<8x128xf32, #tpu.memory_space<vmem>>, vector<8x128xf32>
    tpu.vector_store %arg5[%c0_8, %c0_9], %20 {strides = array<i32>} : memref<8x128xf32, #tpu.memory_space<vmem>>, vector<8x128xf32>,
    %c0_i32_10 = arith.constant 0 : i32
    %22 = arith.cmpi eq, %arg1, %c0_i32_10 : i32
    %23 = arith.extui %22 : i1 to i32
    %c0_i32_11 = arith.constant 0 : i32
    %24 = arith.cmpi ne, %23, %c0_i32_11 : i32
    scf.if %24 {
      %c0_12 = arith.constant 0 : index
      %c0_13 = arith.constant 0 : index
      %25 = vector.load %arg5[%c0_12, %c0_13] : memref<8x128xf32, #tpu.memory_space<vmem>>, vector<8x128xf32>
      %cst_14 = arith.constant dense<0.000000e+00> : vector<8xf32>
      %26 = vector.multi_reduction <add>, %25, %cst_14 [1] : vector<8x128xf32> to vector<8xf32>
      %27 = vector.shape_cast %26 : vector<8xf32> to vector<8x1xf32>
      %cst_15 = arith.constant 5.000000e-03 : f32
      %28 = vector.broadcast %cst_15 : f32 to vector<8x1xf32>
      %29 = arith.mulf %27, %28 : vector<8x1xf32>
      %c0_16 = arith.constant 0 : index
      %c0_17 = arith.constant 0 : index
      %30 = vector.load %arg4[%c0_16, %c0_17] : memref<8x1xf32, #tpu.memory_space<vmem>>, vector<8x1xf32>
      tpu.vector_store %arg4[%c0_16, %c0_17], %29 {strides = array<i32>} : memref<8x1xf32, #tpu.memory_space<vmem>>, vector<8x1xf32>,
    } else {
    }
    return
  }
  func.func @transform_0(%arg0: i32, %arg1: i32) -> (i32, i32) {
    %c0_i32 = arith.constant 0 : i32
    return %arg0, %arg1 : i32, i32
  }
  func.func @transform_1(%arg0: i32, %arg1: i32) -> (i32, i32) {
    %c0_i32 = arith.constant 0 : i32
    return %arg0, %arg1 : i32, i32
  }
  func.func @transform_2(%arg0: i32, %arg1: i32) -> (i32, i32) {
    %c0_i32 = arith.constant 0 : i32
    %c0_i32_0 = arith.constant 0 : i32
    return %arg0, %c0_i32 : i32, i32
  }
}

</mosaic_0001>

<bundles_post_ra>
// kernel: tpu_custom_call.1
= control target key start
LH: loop header
LB: loop body
LE: loop exit
PB: predicated region body
PF: predicated region fallthrough
CT: control target
= control target key end

     0   :  { %7 = vsyncpa [#allocation4], 0  ;;  %s335_s0 = inlined_call_operand.hbm [shape: f32[8,200], index: 0, kind: input, shape index: {}]   ;;  %s336_s1 = inlined_call_operand.hbm [shape: f32[8,200], index: 1, kind: input, shape index: {}]   ;;  %s337_s2 = inlined_call_operand.vmem [shape: f32[8,1], index: 2, kind: output, shape index: {}]  }
   0x1   :  { %8 = vsyncpa [#allocation6], 0  ;;  %s278_s9 = smov [#allocation3]   ;;  %s279_s11 = smov [#allocation5]  }
   0x2   :  { %s15_s10 = sshll.u32 %s278_s9, 4  ;;  %s25_s12 = sshll.u32 %s279_s11, 4  ;;  %s16_s10 = int_to_ptr.vmem [resolvable:$true] %s15_s10  ;;  %s26_s12 = int_to_ptr.vmem [resolvable:$true] %s25_s12 }
   0x3   :  { %s230_s15 = scalar_lea.hbm %s335_s0, 256 }
   0x4   :  { %p231_p0 = scmp.ne.s32.totalorder %s335_s0, %s230_s15  ;;  %p234_p1 = scmp.lt.u32.totalorder %s230_s15, %s335_s0 }
   0x6   :  { %p236_p2 = pnand %p234_p1, %p231_p0 }
   0x8   :  { %239 = shalt.err (!%p236_p2)
}
   0x9   :  { %s240_s20 = scalar_lea.vmem %s16_s10, 256  ;;  %p245_p4 = scmp.lt.s32.totalorder %s16_s10, %s16_s10 }
   0xa   :  { %p241_p3 = scmp.ne.s32.totalorder %s16_s10, %s240_s20  ;;  %p246_p5 = scmp.lt.s32.totalorder %s240_s20, %s240_s20 }
   0xc   :  { %p247_p6 = por %p246_p5, %p245_p4 }
   0xe   :  { %p248_p7 = pnand %p247_p6, %p241_p3 }
  0x10   :  { %251 = shalt.err (!%p248_p7)
}
  0x11   :  { %18 = dma.hbm_to_vmem [thread:$0]  %s335_s0, 256, %s16_s10, [#allocation4]  }
  0x12   :  { %s252_s25 = scalar_lea.hbm %s336_s1, 256 }
  0x13   :  { %p253_p8 = scmp.ne.s32.totalorder %s336_s1, %s252_s25  ;;  %p256_p9 = scmp.lt.u32.totalorder %s252_s25, %s336_s1 }
  0x15   :  { %p258_p10 = pnand %p256_p9, %p253_p8 }
  0x17   :  { %261 = shalt.err (!%p258_p10)
}
  0x18   :  { %s262_s30 = scalar_lea.vmem %s26_s12, 256  ;;  %p267_p12 = scmp.lt.s32.totalorder %s26_s12, %s26_s12 }
  0x19   :  { %p263_p11 = scmp.ne.s32.totalorder %s26_s12, %s262_s30  ;;  %p268_p13 = scmp.lt.s32.totalorder %s262_s30, %s262_s30 }
  0x1b   :  { %p269_p0 = por %p268_p13, %p267_p12 }
  0x1d   :  { %p270_p1 = pnand %p269_p0, %p263_p11 }
  0x1f   :  { %273 = shalt.err (!%p270_p1)
}
  0x20   :  { %28 = dma.hbm_to_vmem [thread:$0]  %s336_s1, 256, %s26_s12, [#allocation6]  }
  0x21   :  { %274 = dma.done.wait [#allocation4], 256  }
  0x22   :  { %275 = vsyncadd [#allocation4], 4294967040 }
  0x23   :  { %276 = dma.done.wait [#allocation6], 256  }
  0x24   :  { %277 = vsyncadd [#allocation6], 4294967040  ;;  %v50_v0 = vlaneseq  ;;  %v280_v1 = vmov 1983009808   ;;  %v40_v6 = vld [vmem:[#allocation3] sm:$0xff]  ;;  %v41_v7 = vld [vmem:[#allocation3 + $0x8] sm:$0xff] }
  0x25   :  { %v64_v2 = vunpack.c.l.s4 %v280_v1  ;;  %v42_v8 = vld [vmem:[#allocation5] sm:$0xff]  ;;  %v43_v9 = vld [vmem:[#allocation5 + $0x8] sm:$0xff]  ;;  %v281_v12 = vmov 1934713408   ;;  %v282_v21 = vmov 0.0   ;;  %vm128_vm1 = vcmask 1041408  }
  0x26   :  { %v51_v3 = vand.u32 127, %v50_v0  ;;  %v67_v5 = vshrl.u32 %v50_v0, 7  ;;  %v44_v10 = vmul.f32 %v42_v8, %v40_v6  ;;  %v95_v13 = vunpack.c.l.s4 %v281_v12 }
  0x27   :  { %v65_v4 = vunpack.c.0.s8 %v64_v2  ;;  %v45_v14 = vmul.f32 %v43_v9, %v41_v7  ;;  %vm193_vm2 = vcmask 1041409   ;;  %vm195_vm3 = vcmask 1042434  }
  0x28   :  { %v52_v11 = vadd.s32 128, %v51_v3  ;;  %v46_v15 = vmul.f32 2.0, %v44_v10  ;;  %v96_v19 = vunpack.c.0.s8 %v95_v13  ;;  %vm197_vm4 = vcmask 1043459  }
  0x29   :  { %v68_v16 = vsub.s32 %v65_v4, %v67_v5  ;;  %v47_v17 = vmul.f32 2.0, %v45_v14  ;;  %vm199_vm5 = vcmask 1044484   ;;  %vm201_vm6 = vcmask 1045509  }
  0x2a   :  { %v48_v18 = vsub.f32 %v40_v6, %v46_v15  ;;  %vm58_vm0 = vcmp.lt.s32.totalorder %v52_v11, 200  ;;  %v99_v28 = vsub.s32 %v96_v19, %v67_v5  ;;  %vm203_vm7 = vcmask 1046534  }
  0x2b   :  { %v49_v20 = vsub.f32 %v41_v7, %v47_v17  ;;  %vm205_vm8 = vcmask 1047559   ;;  %vm217_vm9 = vcmask 7168  }
  0x2c   :  { %v62_v22 = vcombine.high %v48_v18, %v282_v21  ;;  %v69_v23 = vrot.slane %v48_v18, %v68_v16 }
  0x2d   :  { %v60_v24 = vsel %vm58_vm0, %v49_v20, 0.0 }
  0x2e   :  { %v76_v25 = vrot.slane %v62_v22, %v68_v16  ;;  %v77_v26 = vcombine.high %v60_v24, %v282_v21  ;;  %v84_v27 = vrot.slane %v60_v24, %v68_v16 }
  0x30   :  { %v91_v29 = vrot.slane %v77_v26, %v68_v16  ;;  %v92_v30 = vcombine.low %v69_v23, %v84_v27  ;;  %v93_v31 = vcombine.high %v69_v23, %v84_v27 }
  0x32   :  { %v100_v32 = vrot.slane %v92_v30, %v99_v28  ;;  %v107_v33 = vrot.slane %v93_v31, %v99_v28  ;;  %v108_v34 = vcombine.low %v76_v25, %v91_v29  ;;  %v109_v35 = vcombine.high %v76_v25, %v91_v29 }
  0x34   :  { %v116_v36 = vrot.slane %v108_v34, %v99_v28  ;;  %v123_v37 = vrot.slane %v109_v35, %v99_v28  ;;  %v124_v38 = vcombine.high %v100_v32, %v282_v21  ;;  %v125_v39 = vcombine.high %v107_v33, %v282_v21 }
  0x35   :  { %v129_v40 = vsel %vm128_vm1, %v100_v32, 0.0  ;;  %v143_v41 = vsel %vm128_vm1, %v107_v33, 0.0 }
  0x36   :  { %v126_v42 = vcombine.high %v116_v36, %v282_v21  ;;  %v127_v43 = vcombine.high %v123_v37, %v282_v21  ;;  %v130_v44 = vrot.slane %v129_v40, 4  ;;  %v136_v45 = vsel %vm128_vm1, %v124_v38, 0.0 }
  0x37   :  { %v137_v46 = vrot.slane %v136_v45, 4  ;;  %v144_v47 = vrot.slane %v143_v41, 4  ;;  %v150_v48 = vsel %vm128_vm1, %v125_v39, 0.0  ;;  %v157_v49 = vsel %vm128_vm1, %v116_v36, 0.0 }
  0x38   :  { %v131_v50 = vadd.f32 %v130_v44, %v129_v40  ;;  %v151_v51 = vrot.slane %v150_v48, 4  ;;  %v158_v52 = vrot.slane %v157_v49, 4  ;;  %v164_v53 = vsel %vm128_vm1, %v126_v42, 0.0 }
  0x39   :  { %v138_v54 = vadd.f32 %v137_v46, %v136_v45  ;;  %v145_v55 = vadd.f32 %v144_v47, %v143_v41  ;;  %v165_v56 = vrot.slane %v164_v53, 4  ;;  %v171_v57 = vsel %vm128_vm1, %v123_v37, 0.0 }
  0x3a   :  { %v132_v58 = vrot.slane %v131_v50, 2  ;;  %v152_v59 = vadd.f32 %v151_v51, %v150_v48  ;;  %v159_v60 = vadd.f32 %v158_v52, %v157_v49  ;;  %v172_v61 = vrot.slane %v171_v57, 4 }
  0x3b   :  { %v139_v62 = vrot.slane %v138_v54, 2  ;;  %v146_v63 = vrot.slane %v145_v55, 2  ;;  %v166_v0 = vadd.f32 %v165_v56, %v164_v53  ;;  %v178_v1 = vsel %vm128_vm1, %v127_v43, 0.0 }
  0x3c   :  { %v133_v2 = vadd.f32 %v132_v58, %v131_v50  ;;  %v153_v3 = vrot.slane %v152_v59, 2  ;;  %v160_v4 = vrot.slane %v159_v60, 2  ;;  %v173_v5 = vadd.f32 %v172_v61, %v171_v57 }
  0x3d   :  { %v140_v6 = vadd.f32 %v139_v62, %v138_v54  ;;  %v147_v7 = vadd.f32 %v146_v63, %v145_v55  ;;  %v167_v8 = vrot.slane %v166_v0, 2  ;;  %v179_v9 = vrot.slane %v178_v1, 4 }
  0x3e   :  { %v134_v10 = vrot.slane %v133_v2, 1  ;;  %v154_v11 = vadd.f32 %v153_v3, %v152_v59  ;;  %v161_v12 = vadd.f32 %v160_v4, %v159_v60  ;;  %v174_v13 = vrot.slane %v173_v5, 2 }
  0x3f   :  { %v141_v14 = vrot.slane %v140_v6, 1  ;;  %v148_v15 = vrot.slane %v147_v7, 1  ;;  %v168_v16 = vadd.f32 %v167_v8, %v166_v0  ;;  %v180_v17 = vadd.f32 %v179_v9, %v178_v1 }
  0x40   :  { %v135_v18 = vadd.f32 %v134_v10, %v133_v2  ;;  %v155_v19 = vrot.slane %v154_v11, 1  ;;  %v162_v20 = vrot.slane %v161_v12, 1  ;;  %v175_v21 = vadd.f32 %v174_v13, %v173_v5 }
  0x41   :  { %v142_v22 = vadd.f32 %v141_v14, %v140_v6  ;;  %v149_v23 = vadd.f32 %v148_v15, %v147_v7  ;;  %v169_v24 = vrot.slane %v168_v16, 1  ;;  %v181_v25 = vrot.slane %v180_v17, 2 }
  0x42   :  { %v156_v26 = vadd.f32 %v155_v19, %v154_v11  ;;  %v163_v27 = vadd.f32 %v162_v20, %v161_v12  ;;  %v176_v28 = vrot.slane %v175_v21, 1 }
  0x43   :  { %v170_v29 = vadd.f32 %v169_v24, %v168_v16  ;;  %v182_v30 = vadd.f32 %v181_v25, %v180_v17  ;;  %v194_v31 = vsel %vm193_vm2, %v142_v22, %v135_v18 }
  0x44   :  { %v177_v32 = vadd.f32 %v176_v28, %v175_v21  ;;  %v196_v33 = vsel %vm195_vm3, %v149_v23, %v194_v31 }
  0x45   :  { %v183_v34 = vrot.slane %v182_v30, 1  ;;  %v198_v35 = vsel %vm197_vm4, %v156_v26, %v196_v33 }
  0x46   :  { %v200_v36 = vsel %vm199_vm5, %v163_v27, %v198_v35 }
  0x47   :  { %v184_v37 = vadd.f32 %v183_v34, %v182_v30  ;;  %v202_v38 = vsel %vm201_vm6, %v170_v29, %v200_v36 }
  0x48   :  { %v204_v39 = vsel %vm203_vm7, %v177_v32, %v202_v38 }
  0x49   :  { %v206_v40 = vsel %vm205_vm8, %v184_v37, %v204_v39 }
  0x4a   :  { %214 = vadd.xlane.f32.xlu0 %v206_v40 }
  0xd7   :  { %v215_v41 = vpop.xlane.xlu0 %214 }
  0xd8   :  { %v216_v42 = vmul.f32 0.005, %v215_v41 }
  0xda   :  { %218 = vst.msk [vmem:[%s337_s2] sm:$0xff] %vm217_vm9, %v216_v42 }
  0xdb   :  { %223 = vsyncpa [#allocation4], 1 }
  0xdc   :  { %224 = vsyncpa [#allocation6], 1 }

</bundles_post_ra>
